<compile_context>
chip_gen: v5e
topology: v5e:2x2
jax: 0.10.0
libtpu: 0.0.40
codegen_flags: <defaults>
</compile_context>

<pallas_src>
import functools

import jax
import jax.numpy as jnp
from jax.experimental import pallas as pl
from jax.experimental.pallas import tpu as pltpu


def _round_up(x, m):
    return ((x + m - 1) // m) * m


def pad_embedding_table(table):
    """Pad the (V, V) embedding table to (v_pad, v_pad) with the softmax
    pad-column mask baked in. Do this ONCE at parameter init, not per step."""
    V = table.shape[0]
    v_pad = _round_up(max(V, 128), 128)
    table_p = jnp.zeros((v_pad, v_pad), jnp.float32)
    table_p = table_p.at[:V, :V].set(table.astype(jnp.float32))
    # Pad columns of VALID rows get -1e30 so exp(logit - max) == 0 for them;
    # pad rows (>= V) are never selected by the one-hot (idx < V), so stay 0.
    table_p = table_p.at[:V, V:].set(jnp.float32(-1e30))
    return table_p


def bigram_kernel(ids_ref, table_ref, logits_ref, loss_ref, *, n_valid, n_pad):
    ids = ids_ref[...]                      # (tm, 2) int32: [:,0]=idx, [:,1]=targets
    idx = ids[:, 0:1]                       # (tm, 1)
    tgt = ids[:, 1:2]                       # (tm, 1)
    table = table_ref[...]                  # (v_pad, v_pad) f32, resident in VMEM

    tm = ids.shape[0]
    v_pad = table.shape[1]

    # Column iota, hoisted and reused for one-hot and target select.
    col = jax.lax.broadcasted_iota(jnp.int32, (tm, v_pad), 1)

    # Embedding lookup as a one-hot matmul on the MXU: (tm, v_pad) @ (v_pad, v_pad).
    onehot = (col == idx).astype(jnp.float32)
    logits = jnp.dot(onehot, table, preferred_element_type=jnp.float32)

    # Lane-dense, unmasked store of the full padded block.
    # NOTE: padded token rows (>= n_valid) contain table row 0 (pad idx == 0)
    # and pad columns hold -1e30; consumers must slice to [:N, :V] or mask.
    logits_ref[...] = logits

    # Cross-entropy. Pad columns already carry -1e30 (baked into the table),
    # so no extra mask is needed before the softmax reductions.
    m = jnp.max(logits, axis=-1, keepdims=True)                     # (tm, 1)
    sumexp = jnp.sum(jnp.exp(logits - m), axis=-1, keepdims=True)   # pad cols -> 0
    lse = jnp.log(sumexp) + m                                       # (tm, 1)
    # Targets are assumed in [0, V) (matches PyTorch, which also assumes this).
    tgt_logit = jnp.sum(jnp.where(col == tgt, logits, 0.0),
                        axis=-1, keepdims=True)                     # (tm, 1)
    losses = lse - tgt_logit                                        # (tm, 1)

    # Zero padded rows so the wrapper can sum the whole column (static branch:
    # skipped entirely when the token axis is not padded).
    if n_pad > n_valid:
        i = pl.program_id(0)
        row = jax.lax.broadcasted_iota(jnp.int32, (tm, 1), 0) + i * tm
        losses = jnp.where(row < n_valid, losses, 0.0)

    # Unscaled per-row losses; the single divide-by-N happens once in the wrapper.
    loss_ref[...] = losses


def bigram_forward(idx, targets, table_p, vocab_size, *, tm_max=1024,
                   slice_logits=True):
    """Returns (logits, loss) matching the PyTorch module's forward with targets:
    logits is (B*T, V) (or the padded (n_pad, v_pad) slab if slice_logits=False)."""
    assert tm_max % 8 == 0
    B, T = idx.shape
    N = B * T
    v_pad = table_p.shape[0]

    # Pick the largest token block that fits tm_max without over-padding tiny
    # batches; when N is a multiple of 8 there is no row padding at all.
    n_pad8 = _round_up(N, 8)
    if n_pad8 <= tm_max:
        tm = n_pad8
        n_pad = n_pad8
    else:
        tm = tm_max
        n_pad = _round_up(N, tm)
    grid = (n_pad // tm,)

    # Merge idx/targets into one (n_pad, 2) int32 input -> a single tiny DMA/step.
    ids = jnp.stack([idx.reshape(N).astype(jnp.int32),
                     targets.reshape(N).astype(jnp.int32)], axis=-1)  # (N, 2)
    if n_pad != N:
        ids = jnp.pad(ids, ((0, n_pad - N), (0, 0)))

    kernel = functools.partial(bigram_kernel, n_valid=N, n_pad=n_pad)

    logits_pad, loss_rows = pl.pallas_call(
        kernel,
        grid=grid,
        out_shape=(
            jax.ShapeDtypeStruct((n_pad, v_pad), jnp.float32),  # lane-dense logits
            jax.ShapeDtypeStruct((n_pad, 1), jnp.float32),      # per-row losses
        ),
        in_specs=[
            pl.BlockSpec((tm, 2), lambda i: (i, 0)),            # merged idx/targets
            pl.BlockSpec((v_pad, v_pad), lambda i: (0, 0)),     # table, resident
        ],
        out_specs=(
            pl.BlockSpec((tm, v_pad), lambda i: (i, 0)),        # logits block
            pl.BlockSpec((tm, 1), lambda i: (i, 0)),            # loss block
        ),
        compiler_params=pltpu.CompilerParams(
            # All grid steps are independent (per-block outputs) -> parallel,
            # so v7x can shard the token axis across both TensorCores.
            dimension_semantics=("parallel",)),
    )(ids, table_p)

    # Single reduction + single divide (padded rows are already zero).
    loss = jnp.sum(loss_rows) / jnp.float32(N)

    if slice_logits:
        # Matches PyTorch: logits.view(B*T, C). For perf-critical callers pass
        # slice_logits=False and consume the padded slab directly.
        logits = logits_pad[:N, :vocab_size]
    else:
        logits = logits_pad
    return logits, loss


def bigram_forward_ref(idx, targets, table):
    """Pure-JAX reference matching the PyTorch module (targets provided)."""
    logits3 = table[idx]                                  # (B, T, V)
    B, T, V = logits3.shape
    flat = logits3.reshape(B * T, V)
    tflat = targets.reshape(B * T)
    logp = flat - jax.scipy.special.logsumexp(flat, axis=-1, keepdims=True)
    loss = -jnp.mean(logp[jnp.arange(B * T), tflat])
    return flat, loss


if __name__ == "__main__":
    key = jax.random.PRNGKey(0)
    k_tab, k_idx, k_tgt = jax.random.split(key, 3)

    vocab_size = 65   # e.g. character vocab of tiny-shakespeare
    B, T = 2, 8

    # nn.Embedding default init: N(0, 1)
    table = jax.random.normal(k_tab, (vocab_size, vocab_size), dtype=jnp.float32)
    idx = jax.random.randint(k_idx, (B, T), 0, vocab_size, dtype=jnp.int32)
    targets = jax.random.randint(k_tgt, (B, T), 0, vocab_size, dtype=jnp.int32)

    # Pad + bake softmax mask into the table ONCE (parameter-init time).
    table_p = pad_embedding_table(table)

    logits, loss = bigram_forward(idx, targets, table_p, vocab_size)
    jax.block_until_ready((logits, loss))

    logits_ref, loss_ref = bigram_forward_ref(idx, targets, table)
    assert logits.shape == (B * T, vocab_size)
    assert jnp.allclose(logits, logits_ref, atol=1e-5), "logits mismatch"
    assert jnp.allclose(loss, loss_ref, atol=1e-5), "loss mismatch"

    print("KERNEL_OK")
</pallas_src>

<mosaic_0001>
module attributes {stable_mosaic.version = 11 : i64} {
  func.func @bigram_kernel(%arg0: i32, %arg1: memref<16x2xi32, #tpu.memory_space<vmem>>, %arg2: memref<128x128xf32, #tpu.memory_space<vmem>>, %arg3: memref<16x128xf32, #tpu.memory_space<vmem>>, %arg4: memref<16x1xf32, #tpu.memory_space<vmem>>) attributes {dimension_semantics = [#tpu.dimension_semantics<parallel>], iteration_bounds = array<i64: 1>, scalar_prefetch = 0 : i64, scratch_operands = 0 : i64, tpu.core_type = #tpu.core_type<tc>, window_params = [{transform_indices = @transform_0, window_bounds = array<i64: 16, 2>}, {pipeline_mode = #tpu.pipeline_mode<synchronous>, transform_indices = @transform_1, window_bounds = array<i64: 128, 128>}, {transform_indices = @transform_2, window_bounds = array<i64: 16, 128>}, {transform_indices = @transform_3, window_bounds = array<i64: 16, 1>}]} {
    %c0 = arith.constant 0 : index
    %c0_0 = arith.constant 0 : index
    %0 = vector.load %arg1[%c0, %c0_0] : memref<16x2xi32, #tpu.memory_space<vmem>>, vector<16x2xi32>
    %1 = vector.extract_strided_slice %0 {offsets = [0, 0], sizes = [16, 1], strides = [1, 1]} : vector<16x2xi32> to vector<16x1xi32>
    %2 = vector.extract_strided_slice %0 {offsets = [0, 1], sizes = [16, 1], strides = [1, 1]} : vector<16x2xi32> to vector<16x1xi32>
    %c0_1 = arith.constant 0 : index
    %c0_2 = arith.constant 0 : index
    %3 = vector.load %arg2[%c0_1, %c0_2] : memref<128x128xf32, #tpu.memory_space<vmem>>, vector<128x128xf32>
    %4 = tpu.iota {dimensions = array<i32: 1>} : vector<16x128xi32>
    %5 = vector.broadcast %1 : vector<16x1xi32> to vector<16x128xi32>
    %6 = arith.cmpi eq, %4, %5 : vector<16x128xi32>
    %7 = arith.extui %6 : vector<16x128xi1> to vector<16x128xi32>
    %8 = arith.sitofp %7 : vector<16x128xi32> to vector<16x128xf32>
    %cst = arith.constant dense<0.000000e+00> : vector<16x128xf32>
    %9 = tpu.matmul %8, %3, %cst {dimension_numbers = #tpu.dot_dimension_numbers<[1], [0], [0], [1], [0, 0, 1, 1], [], []>} : vector<16x128xf32>, vector<128x128xf32>, vector<16x128xf32> -> vector<16x128xf32>
    %c0_3 = arith.constant 0 : index
    %c0_4 = arith.constant 0 : index
    %10 = vector.load %arg3[%c0_3, %c0_4] : memref<16x128xf32, #tpu.memory_space<vmem>>, vector<16x128xf32>
    tpu.vector_store %arg3[%c0_3, %c0_4], %9 {strides = array<i32>} : memref<16x128xf32, #tpu.memory_space<vmem>>, vector<16x128xf32>,
    %cst_5 = arith.constant dense<0xFF800000> : vector<16xf32>
    %11 = vector.multi_reduction <maximumf>, %9, %cst_5 [1] : vector<16x128xf32> to vector<16xf32>
    %12 = vector.shape_cast %11 : vector<16xf32> to vector<16x1xf32>
    %13 = vector.broadcast %12 : vector<16x1xf32> to vector<16x128xf32>
    %14 = arith.subf %9, %13 : vector<16x128xf32>
    %15 = math.exp %14 : vector<16x128xf32>
    %cst_6 = arith.constant dense<0.000000e+00> : vector<16xf32>
    %16 = vector.multi_reduction <add>, %15, %cst_6 [1] : vector<16x128xf32> to vector<16xf32>
    %17 = vector.shape_cast %16 : vector<16xf32> to vector<16x1xf32>
    %18 = math.log %17 : vector<16x1xf32>
    %19 = arith.addf %18, %12 : vector<16x1xf32>
    %20 = vector.broadcast %2 : vector<16x1xi32> to vector<16x128xi32>
    %21 = arith.cmpi eq, %4, %20 : vector<16x128xi32>
    %cst_7 = arith.constant 0.000000e+00 : f32
    %22 = vector.broadcast %cst_7 : f32 to vector<16x128xf32>
    %23 = arith.select %21, %9, %22 : vector<16x128xi1>, vector<16x128xf32>
    %cst_8 = arith.constant dense<0.000000e+00> : vector<16xf32>
    %24 = vector.multi_reduction <add>, %23, %cst_8 [1] : vector<16x128xf32> to vector<16xf32>
    %25 = vector.shape_cast %24 : vector<16xf32> to vector<16x1xf32>
    %26 = arith.subf %19, %25 : vector<16x1xf32>
    %c0_9 = arith.constant 0 : index
    %c0_10 = arith.constant 0 : index
    %27 = vector.load %arg4[%c0_9, %c0_10] : memref<16x1xf32, #tpu.memory_space<vmem>>, vector<16x1xf32>
    tpu.vector_store %arg4[%c0_9, %c0_10], %26 {strides = array<i32>} : memref<16x1xf32, #tpu.memory_space<vmem>>, vector<16x1xf32>,
    return
  }
  func.func @transform_0(%arg0: i32) -> (i32, i32) {
    %c0_i32 = arith.constant 0 : i32
    %c0_i32_0 = arith.constant 0 : i32
    return %arg0, %c0_i32 : i32, i32
  }
  func.func @transform_1(%arg0: i32) -> (i32, i32) {
    %c0_i32 = arith.constant 0 : i32
    %c0_i32_0 = arith.constant 0 : i32
    %c0_i32_1 = arith.constant 0 : i32
    return %c0_i32, %c0_i32_0 : i32, i32
  }
  func.func @transform_2(%arg0: i32) -> (i32, i32) {
    %c0_i32 = arith.constant 0 : i32
    %c0_i32_0 = arith.constant 0 : i32
    return %arg0, %c0_i32 : i32, i32
  }
  func.func @transform_3(%arg0: i32) -> (i32, i32) {
    %c0_i32 = arith.constant 0 : i32
    %c0_i32_0 = arith.constant 0 : i32
    return %arg0, %c0_i32 : i32, i32
  }
}

</mosaic_0001>

<bundles_post_ra>
// kernel: tpu_custom_call.1
= control target key start
LH: loop header
LB: loop body
LE: loop exit
PB: predicated region body
PF: predicated region fallthrough
CT: control target
= control target key end

     0   :  { %9 = vsyncpa [#allocation3], 0  ;;  %s290_s0 = inlined_call_operand.vmem [shape: s32[16,2], index: 0, kind: input, shape index: {}]   ;;  %s291_s1 = inlined_call_operand.hbm [shape: f32[128,128], index: 1, kind: input, shape index: {}]   ;;  %s292_s2 = inlined_call_operand.hbm [shape: f32[16,128], index: 2, kind: output, shape index: {0}]   ;;  %s293_s3 = inlined_call_operand.vmem [shape: f32[16,1], index: 3, kind: output, shape index: {1}]  }
   0x1   :  { %10 = vsyncpa [#allocation4], 0  ;;  %s17_s14 = sshll.u32 %s291_s1, 4  ;;  %s239_s15 = smov [#allocation2]   ;;  %s18_s14 = int_to_ptr.hbm [resolvable:$true] %s17_s14 }
   0x2   :  { %s19_s16 = sshll.u32 %s239_s15, 4  ;;  %s240_s17 = smov 128   ;;  %s20_s16 = int_to_ptr.vmem [resolvable:$true] %s19_s16 }
   0x3   :  { %s241_s18 = smov 8  }
   0x4   :  { %25 = dma.hbm_to_vmem [thread:$0]  %s18_s14, 2048, %s20_s16, [#allocation3], %s240_s17, %s240_s17, %s241_s18  }
   0x5   :  { %235 = dma.done.wait [#allocation3], 2048  }
   0x6   :  { %236 = vsyncadd [#allocation3], 4294965248  ;;  %v242_v0 = vmov 0   ;;  %v30_v1 = vld [vmem:[%s290_s0] sm:$0xff]  ;;  %v47_v2 = vld [vmem:[#allocation2 + $0x78] sm:$0xff]  ;;  %v243_v19 = vmov 1   ;;  %v48_v20 = vlaneseq }
   0x7   :  { %176 = vset.pattern.permute.xlu0 %v242_v0  ;;  %62 = vmatpush.msra.mxu0 %v47_v2  ;;  %v46_v3 = vld [vmem:[#allocation2 + $0x70] sm:$0xff]  ;;  %v45_v4 = vld [vmem:[#allocation2 + $0x68] sm:$0xff]  ;;  %v44_v5 = vld [vmem:[#allocation2 + $0x60] sm:$0xff]  ;;  %v244_v23 = vmov 1.0   ;;  %s132_s25 = sshll.u32 %s292_s2, 4  ;;  %vm123_vm4 = vcmask 7168   ;;  %s133_s25 = int_to_ptr.hbm [resolvable:$true] %s132_s25 }
   0x8   :  { %51 = vperm.xlu0 %176, %v30_v1   ;;  %153 = vmatpush.msra.mxu1 %v47_v2  ;;  %v31_v6 = vld [vmem:[%s290_s0 + $0x8] sm:$0xff]  ;;  %v43_v7 = vld [vmem:[#allocation2 + $0x58] sm:$0xff]  ;;  %v42_v8 = vld [vmem:[#allocation2 + $0x50] sm:$0xff]  ;;  %v49_v21 = vand.u32 127, %v48_v20  ;;  %s245_s0 = smov [#allocation5]  }
   0x9   :  { %63 = vmatpush.msra.mxu0 %v46_v3  ;;  %v41_v9 = vld [vmem:[#allocation2 + $0x48] sm:$0xff]  ;;  %v40_v10 = vld [vmem:[#allocation2 + $0x40] sm:$0xff]  ;;  %v39_v11 = vld [vmem:[#allocation2 + $0x38] sm:$0xff]  ;;  %177 = vset.pattern.permute.xlu2 %v243_v19  ;;  %s130_s22 = sshll.u32 %s245_s0, 4  ;;  %s131_s22 = int_to_ptr.vmem [resolvable:$true] %s130_s22 }
   0xa   :  { %154 = vmatpush.msra.mxu1 %v46_v3  ;;  %v38_v12 = vld [vmem:[#allocation2 + $0x30] sm:$0xff]  ;;  %v37_v13 = vld [vmem:[#allocation2 + $0x28] sm:$0xff]  ;;  %v36_v14 = vld [vmem:[#allocation2 + $0x20] sm:$0xff]  ;;  %108 = vperm.xlu2 %177, %v30_v1  }
   0xb   :  { %64 = vmatpush.msra.mxu0 %v45_v4  ;;  %v35_v15 = vld [vmem:[#allocation2 + $0x18] sm:$0xff]  ;;  %v34_v16 = vld [vmem:[#allocation2 + $0x10] sm:$0xff]  ;;  %v33_v17 = vld [vmem:[#allocation2 + $0x8] sm:$0xff] }
   0xc   :  { %155 = vmatpush.msra.mxu1 %v45_v4  ;;  %v32_v18 = vld [vmem:[#allocation2] sm:$0xff] }
   0xd   :  { %65 = vmatpush.msra.mxu0 %v44_v5 }
   0xe   :  { %156 = vmatpush.msra.mxu1 %v44_v5 }
   0xf   :  { %66 = vmatpush.msra.mxu0 %v43_v7 }
  0x10   :  { %54 = vperm.xlu0 %176, %v31_v6   ;;  %157 = vmatpush.msra.mxu1 %v43_v7 }
  0x11   :  { %67 = vmatpush.msra.mxu0 %v42_v8 }
  0x12   :  { %158 = vmatpush.msra.mxu1 %v42_v8  ;;  %111 = vperm.xlu2 %177, %v31_v6  }
  0x13   :  { %68 = vmatpush.msra.mxu0 %v41_v9 }
  0x14   :  { %159 = vmatpush.msra.mxu1 %v41_v9 }
  0x15   :  { %69 = vmatpush.msra.mxu0 %v40_v10 }
  0x16   :  { %160 = vmatpush.msra.mxu1 %v40_v10 }
  0x17   :  { %70 = vmatpush.msra.mxu0 %v39_v11 }
  0x18   :  { %161 = vmatpush.msra.mxu1 %v39_v11  ;;  %178 = vset.pattern.permute.xlu0 %v243_v19 }
  0x19   :  { %71 = vmatpush.msra.mxu0 %v38_v12 }
  0x1a   :  { %162 = vmatpush.msra.mxu1 %v38_v12 }
  0x1b   :  { %72 = vmatpush.msra.mxu0 %v37_v13 }
  0x1c   :  { %163 = vmatpush.msra.mxu1 %v37_v13 }
  0x1d   :  { %73 = vmatpush.msra.mxu0 %v36_v14 }
  0x1e   :  { %164 = vmatpush.msra.mxu1 %v36_v14 }
  0x1f   :  { %74 = vmatpush.msra.mxu0 %v35_v15 }
  0x20   :  { %165 = vmatpush.msra.mxu1 %v35_v15 }
  0x21   :  { %75 = vmatpush.msra.mxu0 %v34_v16 }
  0x22   :  { %166 = vmatpush.msra.mxu1 %v34_v16 }
  0x23   :  { %76 = vmatpush.msra.mxu0 %v33_v17 }
  0x24   :  { %167 = vmatpush.msra.mxu1 %v33_v17 }
  0x25   :  { %77 = vmatpush.msra.mxu0 %v32_v18 }
  0x26   :  { %168 = vmatpush.msra.mxu1 %v32_v18 }
  0x64   :  { %v109_v25 = vpop.permute.xlu2 %108 }
  0x65   :  { %vm113_vm2 = vcmp.eq.s32.totalorder %v49_v21, %v109_v25 }
  0x6c   :  { %v112_v37 = vpop.permute.xlu2 %111 }
  0x6d   :  { %vm114_vm3 = vcmp.eq.s32.totalorder %v49_v21, %v112_v37 }
  0x7a   :  { %v52_v22 = vpop.permute.xlu0 %51 }
  0x7b   :  { %vm56_vm0 = vcmp.eq.s32.totalorder %v49_v21, %v52_v22 }
  0x7c   :  { %151 = vmatmul.msk.f32.vlgmr.msra.gmra.mxu0 %vm56_vm0, %v244_v23 }
  0x82   :  { %v55_v24 = vpop.permute.xlu0 %54 }
  0x83   :  { %vm57_vm1 = vcmp.eq.s32.totalorder %v49_v21, %v55_v24 }
  0x84   :  { %152 = vmatmul.msk.f32.vlgmr.msra.gmra.mxu1 %vm57_vm1, %v244_v23 }
  0xf9   :  { %v79_v26 = vpop.f32.mrf.mxu0 }
  0xfa   :  { %85 = vst [vmem:[#allocation5] sm:$0xff] %v79_v26  ;;  %87 = vmax.xlane.f32.xlu1 %v79_v26  ;;  %v115_v27 = vsel %vm113_vm2, %v79_v26, 0.0 }
  0xfb   :  { %117 = vadd.xlane.f32.xlu2 %v115_v27 }
 0x101   :  { %v82_v28 = vpop.f32.mrf.mxu1 }
 0x102   :  { %86 = vst [vmem:[#allocation5 + $0x8] sm:$0xff] %v82_v28  ;;  %89 = vmax.xlane.f32.xlu1 %v82_v28  ;;  %v116_v38 = vsel %vm114_vm3, %v82_v28, 0.0 }
 0x103   :  { %138 = dma.vmem_to_hbm [thread:$0]  %s131_s22, 256, %s133_s25, [#allocation4], %s240_s17, %s240_s17, %s241_s18  }
 0x16d   :  { %v88_v29 = vpop.xlane.xlu1 %87 }
 0x16e   :  { %v91_v30 = vsub.f32 %v79_v26, %v88_v29  ;;  %v118_v44 = vpop.xlane.xlu2 %117 }
 0x170   :  { %v93_v31 = vmul.f32 1.442695, %v91_v30 }
 0x172   :  { %179 = vpow2.f32 %v93_v31 }
 0x175   :  { %v90_v32 = vpop.xlane.xlu1 %89 }
 0x176   :  { %v92_v33 = vsub.f32 %v82_v28, %v90_v32 }
 0x178   :  { %v180_v34 = vpop.eup %179  ;;  %v95_v35 = vmul.f32 1.442695, %v92_v33 }
 0x179   :  { %97 = vadd.xlane.f32.xlu0 %v180_v34 }
 0x17a   :  { %181 = vpow2.f32 %v95_v35 }
 0x180   :  { %v182_v36 = vpop.eup %181 }
 0x181   :  { %99 = vadd.xlane.f32.xlu1 %v182_v36 }
 0x189   :  { %119 = vadd.xlane.f32.xlu1 %v116_v38 }
 0x1ec   :  { %v98_v39 = vpop.xlane.xlu0 %97 }
 0x1ed   :  { %183 = vlog2.f32 %v98_v39 }
 0x1f3   :  { %v184_v40 = vpop.eup %183 }
 0x1f4   :  { %v102_v41 = vmul.f32 0.6931472, %v184_v40  ;;  %v100_v42 = vpop.xlane.xlu1 %99 }
 0x1f5   :  { %185 = vlog2.f32 %v100_v42 }
 0x1f6   :  { %v105_v43 = vadd.f32 %v102_v41, %v88_v29 }
 0x1f8   :  { %v121_v45 = vsub.f32 %v105_v43, %v118_v44 }
 0x1fa   :  { %124 = vst.msk [vmem:[%s293_s3] sm:$0xff] %vm123_vm4, %v121_v45 }
 0x1fb   :  { %v186_v46 = vpop.eup %185 }
 0x1fc   :  { %v104_v47 = vmul.f32 0.6931472, %v186_v46  ;;  %v120_v49 = vpop.xlane.xlu1 %119 }
 0x1fe   :  { %v106_v48 = vadd.f32 %v104_v47, %v90_v32 }
 0x200   :  { %v122_v50 = vsub.f32 %v106_v48, %v120_v49 }
 0x202   :  { %125 = vst.msk [vmem:[%s293_s3 + $0x8] sm:$0xff] %vm123_vm4, %v122_v50 }
 0x203   :  { %237 = dma.done.wait [#allocation4], 256  }
 0x204   :  { %238 = vsyncadd [#allocation4], 4294967040 }
 0x205   :  { %147 = vsyncpa [#allocation3], 1 }
 0x206   :  { %148 = vsyncpa [#allocation4], 1 }

</bundles_post_ra>
